<compile_context>
chip_gen: v6e
topology: v6e:2x2x1
jax: 0.10.0
libtpu: 0.0.40
codegen_flags: <defaults>
</compile_context>

<pallas_src>
import numpy as np
import jax
import jax.numpy as jnp
from jax.experimental import pallas as pl
from jax.experimental.pallas import tpu as pltpu


# Matmul operand dtype.  f32 keeps the kernel bit-compatible with the tight
# 5e-5 reference tolerance.  On v5e/v6e/v7x the MXU is bf16-native, so setting
# this to jnp.bfloat16 (f32 accumulation is kept via preferred_element_type)
# gives ~3x MXU throughput — but requires relaxing the validation tolerance.
MATMUL_DTYPE = jnp.float32


def _round_up(a, m):
    return ((a + m - 1) // m) * m


# ----------------------------------------------------------------------------
# Pallas kernel: full DenseBlock forward + mean-over-trees head, fused.
#
#   refs: x_aug, [per layer: W, M], out
#   x_aug: [Bt, F+1]            input features + trailing constant-1 column
#   W_l:   [F+1 + l*T*S, D*T*C] fully fused selector weights
#                               (rows: x features | bias row | prev outputs)
#   M_l:   [T*C, OUT_LANES]     block-diagonal leaf responses placed at
#                               cols [l*T*S:(l+1)*T*S], plus mean-head columns
#                               at [L*T*S : L*T*S+d_out], zeros elsewhere
#   out:   [Bt, OUT_LANES]      lane-dense (multiple of 128)
# ----------------------------------------------------------------------------
def _make_node_kernel(num_layers, depth, TC, TS):
    def kernel(*refs):
        x_ref, out_ref = refs[0], refs[-1]
        x = x_ref[...].astype(MATMUL_DTYPE)                       # [Bt, F+1]
        acc = None                                                # [Bt, OUT_LANES]
        for l in range(num_layers):
            w_ref, m_ref = refs[1 + 2 * l], refs[2 + 2 * l]
            if l == 0:
                inp = x
            else:
                # previous layers' tree outputs live contiguously in acc[:, :l*TS]
                inp = jnp.concatenate(
                    [x, acc[:, :l * TS].astype(MATMUL_DTYPE)], axis=-1)
            # One MXU matmul emits the sparsemoid pre-activations for all
            # depths / trees / leaves; thresholds, temperatures, the 0.5-affine
            # and the per-leaf code signs are folded into W, so only a clip and
            # the running product over depth remain on the VPU.
            tl = jnp.dot(inp, w_ref[...].astype(MATMUL_DTYPE),
                         preferred_element_type=jnp.float32)      # [Bt, D*TC]
            rw = jnp.clip(tl[:, :TC], 0.0, 1.0)
            for d in range(1, depth):                             # static unroll
                rw = rw * jnp.clip(tl[:, d * TC:(d + 1) * TC], 0.0, 1.0)
            # block-diag leaf responses + folded mean-head columns, one matmul.
            contrib = jnp.dot(rw.astype(MATMUL_DTYPE),
                              m_ref[...].astype(MATMUL_DTYPE),
                              preferred_element_type=jnp.float32)  # [Bt, OUT_LANES]
            acc = contrib if acc is None else acc + contrib
        out_ref[...] = acc.astype(out_ref.dtype)                   # one lane-dense store
    return kernel


def node_block_forward(x, fused_params, out_lanes, *, depth, layer_dim, tree_dim,
                       d_out, b_tile_cap=2048):
    """Run the fused DenseBlock + head Pallas kernel.

    Returns (pred [B] or [B, d_out], block_out [B, L*T, S])."""
    B, F = x.shape
    L = len(fused_params)
    T, C, S = layer_dim, 2 ** depth, tree_dim
    TC, TS = T * C, T * S

    # constant-1 column so thresholds/affine ride inside the matmul as a bias row.
    x_aug = jnp.concatenate([x, jnp.ones((B, 1), x.dtype)], axis=-1)
    Fa = F + 1

    # Batch tiling: 8-sublane aligned; per-tile footprint is only a few MiB so
    # the cap can be large on all generations.  When the batch allows, force
    # >=2 grid steps so the "parallel" axis can shard across v7x's 2 TCs.
    B8 = _round_up(B, 8)
    if B8 >= 16:
        B_TILE = min(b_tile_cap, _round_up((B8 + 1) // 2, 8))
    else:
        B_TILE = B8
    B_pad = _round_up(B8, B_TILE)
    if B_pad != B:
        x_aug = jnp.pad(x_aug, ((0, B_pad - B), (0, 0)))

    in_arrays = [x_aug]
    in_specs = [pl.BlockSpec((B_TILE, Fa), lambda i: (i, 0))]
    for p in fused_params:
        for arr in (p['w'], p['m']):
            in_arrays.append(arr)
            in_specs.append(pl.BlockSpec(arr.shape, lambda i: (0, 0)))

    kernel = _make_node_kernel(L, depth, TC, TS)
    out = pl.pallas_call(
        kernel,
        out_shape=jax.ShapeDtypeStruct((B_pad, out_lanes), jnp.float32),
        grid=(B_pad // B_TILE,),
        in_specs=in_specs,
        out_specs=pl.BlockSpec((B_TILE, out_lanes), lambda i: (i, 0)),
        compiler_params=pltpu.CompilerParams(
            dimension_semantics=("parallel",)),
    )(*in_arrays)

    block_out = out[:B, :L * TS].reshape(B, L * T, S)
    head = out[:B, L * TS:L * TS + d_out]
    pred = jnp.squeeze(head, axis=-1) if d_out == 1 else head
    return pred, block_out


# ----------------------------------------------------------------------------
# Plain-JAX helpers (parameter preprocessing / reference / glue)
# ----------------------------------------------------------------------------
def sparsemax(logits, axis):
    """Sparsemax (Martins & Astudillo) along `axis`."""
    z = jnp.moveaxis(logits, axis, -1)
    K = z.shape[-1]
    z_sorted = jnp.flip(jnp.sort(z, axis=-1), axis=-1)
    z_cumsum = jnp.cumsum(z_sorted, axis=-1)
    k = jnp.arange(1, K + 1, dtype=z.dtype)
    support = (1.0 + k * z_sorted) > z_cumsum
    k_z = jnp.sum(support, axis=-1, keepdims=True)
    tau = (jnp.take_along_axis(z_cumsum, k_z.astype(jnp.int32) - 1, axis=-1) - 1.0) / k_z
    out = jnp.maximum(z - tau, 0.0)
    return jnp.moveaxis(out, -1, axis)


def odst_ref(x, sel, thr, itemp, codes, resp):
    """Pure-JAX reference of one ODST layer (original, unfused math)."""
    fv = jnp.einsum('bf,ftd->btd', x, sel)                     # [B, T, D]
    tl = (fv - thr[None]) * itemp[None]
    bpos = jnp.clip(0.5 * tl + 0.5, 0.0, 1.0)
    bneg = jnp.clip(0.5 - 0.5 * tl, 0.0, 1.0)
    m = (bneg[..., None] * codes[None, None]
         + bpos[..., None] * (1.0 - codes[None, None]))        # [B, T, D, C]
    rw = jnp.prod(m, axis=2)                                   # [B, T, C]
    return jnp.einsum('btc,tsc->bts', rw, resp)                # [B, T, S]


def node_forward_ref(x, raw_params, codes, d_out):
    feats = x
    outs = []
    for p in raw_params:
        o = odst_ref(feats, p['sel'], p['thr'], p['itemp'], codes, p['resp'])
        outs.append(o)
        feats = jnp.concatenate([feats, o.reshape(o.shape[0], -1)], axis=-1)
    block_out = jnp.concatenate(outs, axis=1)                  # [B, L*T, S]
    pred = jnp.mean(block_out[..., :d_out], axis=-2)           # [B, d_out]
    pred = jnp.squeeze(pred, axis=-1) if d_out == 1 else pred
    return pred, block_out


# ----------------------------------------------------------------------------
# Model construction + kernel-oriented parameter fusion
# ----------------------------------------------------------------------------
def build_node_raw_params(key, d_in, num_layers, layer_dim, depth, tree_dim):
    """Deterministic synthetic init of all ODST layer parameters."""
    # TODO(synk): node uses a data-aware (quantile / beta) init for thresholds
    # and log_temperatures on the first forward; synthetic random init here.
    C = 2 ** depth
    indices = np.arange(C)
    offs = 2 ** np.arange(depth)
    codes = ((indices[None, :] // offs[:, None]) % 2).astype(np.float32)  # [D, C]
    codes = jnp.asarray(codes)

    raw = []
    f = d_in
    for _ in range(num_layers):
        key, k1, k2, k3, k4 = jax.random.split(key, 5)
        fsl = jax.random.uniform(k1, (f, layer_dim, depth), jnp.float32)
        thr = jax.random.normal(k2, (layer_dim, depth), jnp.float32)
        log_temp = 0.5 * jax.random.normal(k3, (layer_dim, depth), jnp.float32)
        resp = jax.random.normal(k4, (layer_dim, tree_dim, C), jnp.float32)
        raw.append(dict(sel=sparsemax(fsl, axis=0),     # [F_l, T, D]
                        thr=thr,                        # [T, D]
                        itemp=jnp.exp(-log_temp),       # [T, D]
                        resp=resp))                     # [T, S, C]
        f += layer_dim * tree_dim
    return raw, codes


def prep_fused_params(raw_params, codes, d_in, layer_dim, depth, tree_dim, d_out):
    """Fold thresholds, temperatures, the sparsemoid affine and the leaf code
    signs into the selector weights; build block-diagonal response matrices
    with the mean-over-trees head appended as extra columns."""
    L = len(raw_params)
    T, D, C, S = layer_dim, depth, 2 ** depth, tree_dim
    TC, TS = T * C, T * S
    out_lanes = _round_up(L * TS + d_out, 128)          # lane-dense output slab

    sgn = 1.0 - 2.0 * codes                              # [D, C]: +1 (code 0), -1 (code 1)
    eye_t = jnp.eye(T, dtype=jnp.float32)

    fused = []
    for l, p in enumerate(raw_params):
        sel, thr, itemp, resp = p['sel'], p['thr'], p['itemp'], p['resp']
        Fl = sel.shape[0]                                # d_in + l*TS
        # column layout j = d*T*C + t*C + c
        # W[f, j]  = 0.5 * sgn[d,c] * itemp[t,d] * sel[f,t,d]
        # bias[j]  = 0.5 - 0.5 * sgn[d,c] * thr[t,d] * itemp[t,d]
        w = 0.5 * jnp.einsum('ftd,dc->fdtc', sel * itemp[None], sgn)
        w = w.reshape(Fl, D * TC)
        bias = 0.5 - 0.5 * jnp.einsum('td,dc->dtc', thr * itemp, sgn)
        bias = bias.reshape(1, D * TC)
        # stacked rows: [x features | constant-1 bias row | previous-layer outputs]
        w_stack = jnp.concatenate([w[:d_in], bias, w[d_in:]], axis=0)

        # block-diagonal leaf responses + folded mean-head columns
        m_block = jnp.einsum('tsc,tu->tcus', resp, eye_t).reshape(TC, TS)
        m_cat = jnp.zeros((TC, out_lanes), jnp.float32)
        m_cat = m_cat.at[:, l * TS:(l + 1) * TS].set(m_block)
        head = jnp.transpose(resp[:, :d_out, :], (0, 2, 1)).reshape(TC, d_out) / (L * T)
        m_cat = m_cat.at[:, L * TS:L * TS + d_out].set(head)

        fused.append(dict(w=w_stack, m=m_cat))
    return fused, out_lanes


if __name__ == "__main__":
    # config (small)
    B = 8
    d_num = 6
    categories = [3, 5]
    d_embedding = 4
    num_layers = 2
    layer_dim = 16      # trees per layer
    depth = 3
    tree_dim = 2
    d_out = 1
    d_in = d_num + len(categories) * d_embedding

    key = jax.random.PRNGKey(0)
    key, k_emb, k_num, k_c0, k_c1, k_params = jax.random.split(key, 6)

    # categorical embeddings (kaiming-uniform-ish synthetic init)
    emb_table = jax.random.uniform(k_emb, (sum(categories), d_embedding),
                                   jnp.float32, -0.5, 0.5)
    category_offsets = jnp.asarray(np.cumsum([0] + categories[:-1]), jnp.int32)

    # inputs
    x_num = jax.random.normal(k_num, (B, d_num), jnp.float32)
    x_cat = jnp.stack(
        [jax.random.randint(k_c0, (B,), 0, categories[0]),
         jax.random.randint(k_c1, (B,), 0, categories[1])], axis=-1).astype(jnp.int32)

    # embedding lookup + concat (glue, matches torch forward)
    x_cat_emb = jnp.take(emb_table, x_cat + category_offsets[None], axis=0)   # [B, n_cat, d_emb]
    x = jnp.concatenate([x_num, x_cat_emb.reshape(B, -1)], axis=-1)           # [B, d_in]

    raw_params, codes = build_node_raw_params(
        k_params, d_in, num_layers, layer_dim, depth, tree_dim)
    fused_params, out_lanes = prep_fused_params(
        raw_params, codes, d_in, layer_dim, depth, tree_dim, d_out)

    pred, block_out = node_block_forward(
        x, fused_params, out_lanes,
        depth=depth, layer_dim=layer_dim, tree_dim=tree_dim, d_out=d_out)
    pred = jax.block_until_ready(pred)

    # sanity check against pure-JAX reference (original unfused math)
    ref_pred, ref_block = node_forward_ref(x, raw_params, codes, d_out)
    ref_pred = jax.block_until_ready(ref_pred)
    np.testing.assert_allclose(np.asarray(block_out), np.asarray(ref_block),
                               rtol=5e-5, atol=5e-5)
    np.testing.assert_allclose(np.asarray(pred), np.asarray(ref_pred),
                               rtol=5e-5, atol=5e-5)
    assert pred.shape == (B,)

    print("KERNEL_OK")
</pallas_src>

<mosaic_0001>
module attributes {stable_mosaic.version = 11 : i64} {
  func.func @kernel(%arg0: i32, %arg1: memref<8x15xf32, #tpu.memory_space<vmem>>, %arg2: memref<15x384xf32, #tpu.memory_space<vmem>>, %arg3: memref<128x128xf32, #tpu.memory_space<vmem>>, %arg4: memref<47x384xf32, #tpu.memory_space<vmem>>, %arg5: memref<128x128xf32, #tpu.memory_space<vmem>>, %arg6: memref<8x128xf32, #tpu.memory_space<vmem>>) attributes {dimension_semantics = [#tpu.dimension_semantics<parallel>], iteration_bounds = array<i64: 1>, scalar_prefetch = 0 : i64, scratch_operands = 0 : i64, tpu.core_type = #tpu.core_type<tc>, window_params = [{transform_indices = @transform_0, window_bounds = array<i64: 8, 15>}, {pipeline_mode = #tpu.pipeline_mode<synchronous>, transform_indices = @transform_1, window_bounds = array<i64: 15, 384>}, {pipeline_mode = #tpu.pipeline_mode<synchronous>, transform_indices = @transform_2, window_bounds = array<i64: 128, 128>}, {pipeline_mode = #tpu.pipeline_mode<synchronous>, transform_indices = @transform_3, window_bounds = array<i64: 47, 384>}, {pipeline_mode = #tpu.pipeline_mode<synchronous>, transform_indices = @transform_4, window_bounds = array<i64: 128, 128>}, {transform_indices = @transform_5, window_bounds = array<i64: 8, 128>}]} {
    %c0 = arith.constant 0 : index
    %c0_0 = arith.constant 0 : index
    %0 = vector.load %arg1[%c0, %c0_0] : memref<8x15xf32, #tpu.memory_space<vmem>>, vector<8x15xf32>
    %c0_1 = arith.constant 0 : index
    %c0_2 = arith.constant 0 : index
    %1 = vector.load %arg2[%c0_1, %c0_2] : memref<15x384xf32, #tpu.memory_space<vmem>>, vector<15x384xf32>
    %cst = arith.constant dense<0.000000e+00> : vector<8x384xf32>
    %2 = tpu.matmul %0, %1, %cst {dimension_numbers = #tpu.dot_dimension_numbers<[1], [0], [0], [1], [0, 0, 1, 1], [], []>} : vector<8x15xf32>, vector<15x384xf32>, vector<8x384xf32> -> vector<8x384xf32>
    %3 = vector.extract_strided_slice %2 {offsets = [0, 0], sizes = [8, 128], strides = [1, 1]} : vector<8x384xf32> to vector<8x128xf32>
    %cst_3 = arith.constant 0.000000e+00 : f32
    %cst_4 = arith.constant 1.000000e+00 : f32
    %4 = vector.broadcast %cst_3 : f32 to vector<8x128xf32>
    %5 = arith.maximumf %4, %3 : vector<8x128xf32>
    %6 = vector.broadcast %cst_4 : f32 to vector<8x128xf32>
    %7 = arith.minimumf %6, %5 : vector<8x128xf32>
    %8 = vector.extract_strided_slice %2 {offsets = [0, 128], sizes = [8, 128], strides = [1, 1]} : vector<8x384xf32> to vector<8x128xf32>
    %cst_5 = arith.constant 0.000000e+00 : f32
    %cst_6 = arith.constant 1.000000e+00 : f32
    %9 = vector.broadcast %cst_5 : f32 to vector<8x128xf32>
    %10 = arith.maximumf %9, %8 : vector<8x128xf32>
    %11 = vector.broadcast %cst_6 : f32 to vector<8x128xf32>
    %12 = arith.minimumf %11, %10 : vector<8x128xf32>
    %13 = arith.mulf %7, %12 : vector<8x128xf32>
    %14 = vector.extract_strided_slice %2 {offsets = [0, 256], sizes = [8, 128], strides = [1, 1]} : vector<8x384xf32> to vector<8x128xf32>
    %cst_7 = arith.constant 0.000000e+00 : f32
    %cst_8 = arith.constant 1.000000e+00 : f32
    %15 = vector.broadcast %cst_7 : f32 to vector<8x128xf32>
    %16 = arith.maximumf %15, %14 : vector<8x128xf32>
    %17 = vector.broadcast %cst_8 : f32 to vector<8x128xf32>
    %18 = arith.minimumf %17, %16 : vector<8x128xf32>
    %19 = arith.mulf %13, %18 : vector<8x128xf32>
    %c0_9 = arith.constant 0 : index
    %c0_10 = arith.constant 0 : index
    %20 = vector.load %arg3[%c0_9, %c0_10] : memref<128x128xf32, #tpu.memory_space<vmem>>, vector<128x128xf32>
    %cst_11 = arith.constant dense<0.000000e+00> : vector<8x128xf32>
    %21 = tpu.matmul %19, %20, %cst_11 {dimension_numbers = #tpu.dot_dimension_numbers<[1], [0], [0], [1], [0, 0, 1, 1], [], []>} : vector<8x128xf32>, vector<128x128xf32>, vector<8x128xf32> -> vector<8x128xf32>
    %22 = vector.extract_strided_slice %21 {offsets = [0, 0], sizes = [8, 32], strides = [1, 1]} : vector<8x128xf32> to vector<8x32xf32>
    %23 = tpu.concatenate %0, %22 in 1 : vector<8x15xf32>, vector<8x32xf32> -> vector<8x47xf32>
    %c0_12 = arith.constant 0 : index
    %c0_13 = arith.constant 0 : index
    %24 = vector.load %arg4[%c0_12, %c0_13] : memref<47x384xf32, #tpu.memory_space<vmem>>, vector<47x384xf32>
    %cst_14 = arith.constant dense<0.000000e+00> : vector<8x384xf32>
    %25 = tpu.matmul %23, %24, %cst_14 {dimension_numbers = #tpu.dot_dimension_numbers<[1], [0], [0], [1], [0, 0, 1, 1], [], []>} : vector<8x47xf32>, vector<47x384xf32>, vector<8x384xf32> -> vector<8x384xf32>
    %26 = vector.extract_strided_slice %25 {offsets = [0, 0], sizes = [8, 128], strides = [1, 1]} : vector<8x384xf32> to vector<8x128xf32>
    %cst_15 = arith.constant 0.000000e+00 : f32
    %cst_16 = arith.constant 1.000000e+00 : f32
    %27 = vector.broadcast %cst_15 : f32 to vector<8x128xf32>
    %28 = arith.maximumf %27, %26 : vector<8x128xf32>
    %29 = vector.broadcast %cst_16 : f32 to vector<8x128xf32>
    %30 = arith.minimumf %29, %28 : vector<8x128xf32>
    %31 = vector.extract_strided_slice %25 {offsets = [0, 128], sizes = [8, 128], strides = [1, 1]} : vector<8x384xf32> to vector<8x128xf32>
    %cst_17 = arith.constant 0.000000e+00 : f32
    %cst_18 = arith.constant 1.000000e+00 : f32
    %32 = vector.broadcast %cst_17 : f32 to vector<8x128xf32>
    %33 = arith.maximumf %32, %31 : vector<8x128xf32>
    %34 = vector.broadcast %cst_18 : f32 to vector<8x128xf32>
    %35 = arith.minimumf %34, %33 : vector<8x128xf32>
    %36 = arith.mulf %30, %35 : vector<8x128xf32>
    %37 = vector.extract_strided_slice %25 {offsets = [0, 256], sizes = [8, 128], strides = [1, 1]} : vector<8x384xf32> to vector<8x128xf32>
    %cst_19 = arith.constant 0.000000e+00 : f32
    %cst_20 = arith.constant 1.000000e+00 : f32
    %38 = vector.broadcast %cst_19 : f32 to vector<8x128xf32>
    %39 = arith.maximumf %38, %37 : vector<8x128xf32>
    %40 = vector.broadcast %cst_20 : f32 to vector<8x128xf32>
    %41 = arith.minimumf %40, %39 : vector<8x128xf32>
    %42 = arith.mulf %36, %41 : vector<8x128xf32>
    %c0_21 = arith.constant 0 : index
    %c0_22 = arith.constant 0 : index
    %43 = vector.load %arg5[%c0_21, %c0_22] : memref<128x128xf32, #tpu.memory_space<vmem>>, vector<128x128xf32>
    %cst_23 = arith.constant dense<0.000000e+00> : vector<8x128xf32>
    %44 = tpu.matmul %42, %43, %cst_23 {dimension_numbers = #tpu.dot_dimension_numbers<[1], [0], [0], [1], [0, 0, 1, 1], [], []>} : vector<8x128xf32>, vector<128x128xf32>, vector<8x128xf32> -> vector<8x128xf32>
    %45 = arith.addf %21, %44 : vector<8x128xf32>
    %c0_24 = arith.constant 0 : index
    %c0_25 = arith.constant 0 : index
    %46 = vector.load %arg6[%c0_24, %c0_25] : memref<8x128xf32, #tpu.memory_space<vmem>>, vector<8x128xf32>
    tpu.vector_store %arg6[%c0_24, %c0_25], %45 {strides = array<i32>} : memref<8x128xf32, #tpu.memory_space<vmem>>, vector<8x128xf32>,
    return
  }
  func.func @transform_0(%arg0: i32) -> (i32, i32) {
    %c0_i32 = arith.constant 0 : i32
    %c0_i32_0 = arith.constant 0 : i32
    return %arg0, %c0_i32 : i32, i32
  }
  func.func @transform_1(%arg0: i32) -> (i32, i32) {
    %c0_i32 = arith.constant 0 : i32
    %c0_i32_0 = arith.constant 0 : i32
    %c0_i32_1 = arith.constant 0 : i32
    return %c0_i32, %c0_i32_0 : i32, i32
  }
  func.func @transform_2(%arg0: i32) -> (i32, i32) {
    %c0_i32 = arith.constant 0 : i32
    %c0_i32_0 = arith.constant 0 : i32
    %c0_i32_1 = arith.constant 0 : i32
    return %c0_i32, %c0_i32_0 : i32, i32
  }
  func.func @transform_3(%arg0: i32) -> (i32, i32) {
    %c0_i32 = arith.constant 0 : i32
    %c0_i32_0 = arith.constant 0 : i32
    %c0_i32_1 = arith.constant 0 : i32
    return %c0_i32, %c0_i32_0 : i32, i32
  }
  func.func @transform_4(%arg0: i32) -> (i32, i32) {
    %c0_i32 = arith.constant 0 : i32
    %c0_i32_0 = arith.constant 0 : i32
    %c0_i32_1 = arith.constant 0 : i32
    return %c0_i32, %c0_i32_0 : i32, i32
  }
  func.func @transform_5(%arg0: i32) -> (i32, i32) {
    %c0_i32 = arith.constant 0 : i32
    %c0_i32_0 = arith.constant 0 : i32
    return %arg0, %c0_i32 : i32, i32
  }
}

</mosaic_0001>

<bundles_post_ra>
// kernel: tpu_custom_call.1
= control target key start
LH: loop header
LB: loop body
LE: loop exit
PB: predicated region body
PF: predicated region fallthrough
CT: control target
= control target key end

     0   :  { %10 = vsyncpa [#allocation3], 0  ;;  %s1049_s0 = inlined_call_operand.hbm [shape: f32[8,15], index: 0, kind: input, shape index: {}]   ;;  %s1050_s1 = inlined_call_operand.hbm [shape: f32[15,384], index: 1, kind: input, shape index: {}]   ;;  %s1051_s2 = inlined_call_operand.hbm [shape: f32[128,128], index: 2, kind: input, shape index: {}]   ;;  %s1052_s3 = inlined_call_operand.hbm [shape: f32[47,384], index: 3, kind: input, shape index: {}]   ;;  %s1053_s4 = inlined_call_operand.hbm [shape: f32[128,128], index: 4, kind: input, shape index: {}]   ;;  %s1054_s5 = inlined_call_operand.hbm [shape: f32[8,128], index: 5, kind: output, shape index: {}]  }
   0x1   :  { %11 = vsyncpa [#allocation6], 0 }
   0x2   :  { %12 = vsyncpa [#allocation9], 0 }
   0x3   :  { %13 = vsyncpa [#allocation4], 0  ;;  %s920_s18 = smov [#allocation5]  }
   0x4   :  { %s29_s19 = sshll.u32 %s920_s18, 4  ;;  %s30_s19 = int_to_ptr.vmem [resolvable:$true] %s29_s19 }
   0x5   :  { %s800_s20 = scalar_lea.vmem %s30_s19, 768  ;;  %p805_p1 = scmp.lt.s32.totalorder %s30_s19, %s30_s19 }
   0x6   :  { %p801_p0 = scmp.ne.s32.totalorder %s30_s19, %s800_s20  ;;  %p806_p2 = scmp.lt.s32.totalorder %s800_s20, %s800_s20 }
   0x8   :  { %p807_p3 = por %p806_p2, %p805_p1 }
   0xa   :  { %p808_p4 = pnand %p807_p3, %p801_p0 }
   0xc   :  { %811 = shalt.err (!%p808_p4)
}
   0xd   :  { %s921_s21 = smov 384   ;;  %s922_s22 = smov 24  }
   0xe   :  { %35 = dma.hbm_to_vmem [thread:$0]  %s1050_s1, 768, %s30_s19, [#allocation6], %s921_s21, %s921_s21, %s922_s22  }
   0xf   :  { %s923_s25 = smov [#allocation8]   ;;  %s924_s27 = smov [#allocation2]  }
  0x10   :  { %s53_s26 = sshll.u32 %s923_s25, 4  ;;  %s20_s28 = sshll.u32 %s924_s27, 4  ;;  %s54_s26 = int_to_ptr.vmem [resolvable:$true] %s53_s26  ;;  %s21_s28 = int_to_ptr.vmem [resolvable:$true] %s20_s28 }
  0x11   :  { %s820_s29 = scalar_lea.vmem %s54_s26, 2304  ;;  %p825_p6 = scmp.lt.s32.totalorder %s54_s26, %s54_s26 }
  0x12   :  { %p821_p5 = scmp.ne.s32.totalorder %s54_s26, %s820_s29  ;;  %p826_p7 = scmp.lt.s32.totalorder %s820_s29, %s820_s29 }
  0x14   :  { %p827_p8 = por %p826_p7, %p825_p6 }
  0x16   :  { %p828_p9 = pnand %p827_p8, %p821_p5 }
  0x18   :  { %831 = shalt.err (!%p828_p9)
}
  0x19   :  { %59 = dma.hbm_to_vmem [thread:$0]  %s1052_s3, 2304, %s54_s26, [#allocation9], %s921_s21, %s921_s21, %s922_s22  }
  0x1a   :  { %s840_s7 = scalar_lea.vmem %s21_s28, 128  ;;  %p845_p11 = scmp.lt.s32.totalorder %s21_s28, %s21_s28 }
  0x1b   :  { %p841_p10 = scmp.ne.s32.totalorder %s21_s28, %s840_s7  ;;  %p846_p12 = scmp.lt.s32.totalorder %s840_s7, %s840_s7 }
  0x1d   :  { %p847_p13 = por %p846_p12, %p845_p11 }
  0x1f   :  { %p848_p0 = pnand %p847_p13, %p841_p10 }
  0x21   :  { %851 = shalt.err (!%p848_p0)
}
  0x22   :  { %23 = dma.hbm_to_vmem [thread:$0]  %s1049_s0, 128, %s21_s28, [#allocation3]  }
  0x23   :  { %s925_s9 = smov [#allocation7]  }
  0x24   :  { %s41_s10 = sshll.u32 %s925_s9, 4  ;;  %s42_s10 = int_to_ptr.vmem [resolvable:$true] %s41_s10 }
  0x25   :  { %s860_s11 = scalar_lea.vmem %s42_s10, 2048  ;;  %p865_p2 = scmp.lt.s32.totalorder %s42_s10, %s42_s10 }
  0x26   :  { %p861_p1 = scmp.ne.s32.totalorder %s42_s10, %s860_s11  ;;  %p866_p3 = scmp.lt.s32.totalorder %s860_s11, %s860_s11 }
  0x28   :  { %p867_p4 = por %p866_p3, %p865_p2 }
  0x2a   :  { %p868_p5 = pnand %p867_p4, %p861_p1 }
  0x2c   :  { %871 = shalt.err (!%p868_p5)
}
  0x2d   :  { %s926_s3 = smov 128   ;;  %s927_s12 = smov 8  }
  0x2e   :  { %47 = dma.hbm_to_vmem [thread:$0]  %s1051_s2, 2048, %s42_s10, [#allocation6], %s926_s3, %s926_s3, %s927_s12  }
  0x2f   :  { %s928_s15 = smov [#allocation10]  }
  0x30   :  { %s65_s16 = sshll.u32 %s928_s15, 4  ;;  %s66_s16 = int_to_ptr.vmem [resolvable:$true] %s65_s16 }
  0x31   :  { %s880_s0 = scalar_lea.vmem %s66_s16, 2048  ;;  %p885_p7 = scmp.lt.s32.totalorder %s66_s16, %s66_s16 }
  0x32   :  { %p881_p6 = scmp.ne.s32.totalorder %s66_s16, %s880_s0  ;;  %p886_p8 = scmp.lt.s32.totalorder %s880_s0, %s880_s0 }
  0x34   :  { %p887_p9 = por %p886_p8, %p885_p7 }
  0x36   :  { %p888_p10 = pnand %p887_p9, %p881_p6 }
  0x38   :  { %891 = shalt.err (!%p888_p10)
}
  0x39   :  { %71 = dma.hbm_to_vmem [thread:$0]  %s1053_s4, 2048, %s66_s16, [#allocation9], %s926_s3, %s926_s3, %s927_s12  }
  0x3a   :  { %912 = dma.done.wait [#allocation3], 128  }
  0x3b   :  { %913 = vsyncadd [#allocation3], 4294967168 }
  0x3c   :  { %914 = dma.done.wait [#allocation6], 2816  }
  0x3d   :  { %915 = vsyncadd [#allocation6], 4294964480 }
  0x3e   :  { %916 = dma.done.wait [#allocation9], 4352  }
  0x3f   :  { %917 = vsyncadd [#allocation9], 4294962944  ;;  %v929_v0 = vmov 0.0   ;;  %vm930_vm0 = vmmov 0   ;;  %vm98_vm1 = vcmask 1046528   ;;  %v89_v3 = vld [vmem:[#allocation5 + $0x8] sm:$0xff] }
  0x40   :  { %687 = vmatprep.subr.mxu1 %v929_v0  ;;  %172 = vmatprep.mubr.f32.mxu0 %v929_v0  ;;  %v92_v1 = vld [vmem:[#allocation5 + $0x20] sm:$0x7f]  ;;  %v91_v2 = vld [vmem:[#allocation5 + $0x18] sm:$0x7f]  ;;  %v93_v5 = vld [vmem:[#allocation5 + $0x28] sm:$0x7f] }
  0x41   :  { %691 = vmatprep.mubr.msk.f32.mxu1 %vm930_vm0, %v929_v0  ;;  %633 = vmatprep.subr.msk.mxu0 %vm98_vm1, %v92_v1  ;;  %v88_v4 = vld [vmem:[#allocation5] sm:$0xff]  ;;  %v985_v6 = vld [vmem:[#allocation2] sm:$0xff]  ;;  %vm94_vm2 = vcmask 121856   ;;  %v90_v7 = vld [vmem:[#allocation5 + $0x10] sm:$0xff]  ;;  %s931_s2 = smov 15   ;;  %vm366_vm3 = vcmask 384000  }
  0x42   :  { %634 = vmatpush1.msk.msra.mxu0 %vm98_vm1, %v91_v2  ;;  %688 = vmatpush3.msk.msra.mxu1 %vm98_vm1, %v93_v5  ;;  %v272_v8 = vld [vmem:[#allocation7 + $0x78] sm:$0xff]  ;;  %v271_v9 = vld [vmem:[#allocation7 + $0x70] sm:$0xff]  ;;  %v270_v10 = vld [vmem:[#allocation7 + $0x68] sm:$0xff]  ;;  %s932_s4 = smov [#allocation11]  }
  0x43   :  { %138 = vmatprep.subr.mxu0 %v89_v3  ;;  %689 = vmatprep.subr.mxu1 %v929_v0  ;;  %v269_v11 = vld [vmem:[#allocation7 + $0x60] sm:$0xff]  ;;  %v268_v12 = vld [vmem:[#allocation7 + $0x58] sm:$0xff]  ;;  %v267_v13 = vld [vmem:[#allocation7 + $0x50] sm:$0xff]  ;;  %s622_s19 = sshll.u32 %s932_s4, 4  ;;  %s623_s19 = int_to_ptr.vmem [resolvable:$true] %s622_s19 }
  0x44   :  { %139 = vmatpush1.msra.mxu0 %v88_v4  ;;  %690 = vmatpush3.msra.mxu1 %v90_v7  ;;  %v266_v14 = vld [vmem:[#allocation7 + $0x48] sm:$0xff]  ;;  %v265_v15 = vld [vmem:[#allocation7 + $0x40] sm:$0xff]  ;;  %v264_v16 = vld [vmem:[#allocation7 + $0x38] sm:$0xff]  ;;  %s892_s20 = scalar_lea.vmem %s623_s19, 128  ;;  %p897_p12 = scmp.lt.s32.totalorder %s623_s19, %s623_s19 }
  0x45   :  { %635 = vmatmul.mubr.msk.f32.vlgmr.msra.gmra.mxu0 %vm94_vm2, %v985_v6  ;;  %692 = vmatmul.mubr.msk.f32.vlgmr.msra.gmra.mxu1 %vm94_vm2, %v985_v6  ;;  %v263_v17 = vld [vmem:[#allocation7 + $0x30] sm:$0xff]  ;;  %v262_v18 = vld [vmem:[#allocation7 + $0x28] sm:$0xff]  ;;  %v261_v19 = vld [vmem:[#allocation7 + $0x20] sm:$0xff]  ;;  %p893_p11 = scmp.ne.s32.totalorder %s623_s19, %s892_s20  ;;  %p898_p13 = scmp.lt.s32.totalorder %s892_s20, %s892_s20 }
  0x46   :  { %694 = vmatprep.subr.mxu0 %v929_v0  ;;  %726 = vmatprep.mubr.msk.f32.mxu0 %vm930_vm0, %v929_v0  ;;  %v260_v20 = vld [vmem:[#allocation7 + $0x18] sm:$0xff]  ;;  %v259_v21 = vld [vmem:[#allocation7 + $0x10] sm:$0xff]  ;;  %v258_v22 = vld [vmem:[#allocation7 + $0x8] sm:$0xff] }
  0x47   :  { %695 = vmatpush3.msra.mxu0 %v272_v8  ;;  %729 = vmatprep.subr.mxu1 %v929_v0  ;;  %v257_v23 = vld [vmem:[#allocation7] sm:$0xff]  ;;  %v363_v37 = vld [vmem:[#allocation8 + $0x78] sm:$0x7f]  ;;  %v365_v38 = vld [vmem:[#allocation8 + $0x88] sm:$0x7f]  ;;  %p899_p0 = por %p898_p13, %p897_p12 }
  0x48   :  { %696 = vmatprep.subr.mxu0 %v929_v0  ;;  %741 = vmatprep.mubr.msk.f32.mxu1 %vm930_vm0, %v929_v0  ;;  %v364_v36 = vld [vmem:[#allocation8 + $0x80] sm:$0x7f]  ;;  %v361_v39 = vld [vmem:[#allocation8 + $0x68] sm:$0xff]  ;;  %v362_v41 = vld [vmem:[#allocation8 + $0x70] sm:$0xff] }
  0x49   :  { %697 = vmatpush3.msra.mxu0 %v271_v9  ;;  %730 = vmatpush3.msk.msra.mxu1 %vm98_vm1, %v365_v38  ;;  %v360_v40 = vld [vmem:[#allocation8 + $0x60] sm:$0xff]  ;;  %v358_v42 = vld [vmem:[#allocation8 + $0x50] sm:$0xff]  ;;  %v359_v43 = vld [vmem:[#allocation8 + $0x58] sm:$0xff]  ;;  %p900_p1 = pnand %p899_p0, %p893_p11 }
  0x4a   :  { %698 = vmatprep.subr.mxu0 %v929_v0  ;;  %731 = vmatprep.subr.mxu1 %v929_v0  ;;  %v357_v44 = vld [vmem:[#allocation8 + $0x48] sm:$0xff]  ;;  %v355_v45 = vld [vmem:[#allocation8 + $0x38] sm:$0xff]  ;;  %v356_v46 = vld [vmem:[#allocation8 + $0x40] sm:$0xff] }
  0x4b   :  { %699 = vmatpush3.msra.mxu0 %v270_v10  ;;  %732 = vmatpush3.msra.mxu1 %v362_v41  ;;  %v354_v47 = vld [vmem:[#allocation8 + $0x30] sm:$0xff]  ;;  %v352_v48 = vld [vmem:[#allocation8 + $0x20] sm:$0xff]  ;;  %v353_v49 = vld [vmem:[#allocation8 + $0x28] sm:$0xff] }
  0x4c   :  { %700 = vmatprep.subr.mxu0 %v929_v0  ;;  %733 = vmatprep.subr.mxu1 %v929_v0  ;;  %v351_v50 = vld [vmem:[#allocation8 + $0x18] sm:$0xff]  ;;  %v349_v51 = vld [vmem:[#allocation8 + $0x8] sm:$0xff]  ;;  %v348_v52 = vld [vmem:[#allocation8] sm:$0xff] }
  0x4d   :  { %701 = vmatpush3.msra.mxu0 %v269_v11  ;;  %734 = vmatpush3.msra.mxu1 %v359_v43  ;;  %v350_v53 = vld [vmem:[#allocation8 + $0x10] sm:$0xff]  ;;  %v543_v57 = vld [vmem:[#allocation10 + $0x78] sm:$0xff]  ;;  %v542_v59 = vld [vmem:[#allocation10 + $0x70] sm:$0xff] }
  0x4e   :  { %702 = vmatprep.subr.mxu0 %v929_v0  ;;  %735 = vmatprep.subr.mxu1 %v929_v0  ;;  %v541_v60 = vld [vmem:[#allocation10 + $0x68] sm:$0xff]  ;;  %v540_v61 = vld [vmem:[#allocation10 + $0x60] sm:$0xff]  ;;  %v539_v62 = vld [vmem:[#allocation10 + $0x58] sm:$0xff] }
  0x4f   :  { %703 = vmatpush3.msra.mxu0 %v268_v12  ;;  %736 = vmatpush3.msra.mxu1 %v356_v46  ;;  %v538_v63 = vld [vmem:[#allocation10 + $0x50] sm:$0xff]  ;;  %v537_v1 = vld [vmem:[#allocation10 + $0x48] sm:$0xff]  ;;  %v536_v2 = vld [vmem:[#allocation10 + $0x40] sm:$0xff] }
  0x50   :  { %704 = vmatprep.subr.mxu0 %v929_v0  ;;  %737 = vmatprep.subr.mxu1 %v929_v0  ;;  %v535_v3 = vld [vmem:[#allocation10 + $0x38] sm:$0xff]  ;;  %v534_v4 = vld [vmem:[#allocation10 + $0x30] sm:$0xff]  ;;  %v533_v5 = vld [vmem:[#allocation10 + $0x28] sm:$0xff] }
  0x51   :  { %705 = vmatpush3.msra.mxu0 %v267_v13  ;;  %738 = vmatpush3.msra.mxu1 %v353_v49  ;;  %v531_v7 = vld [vmem:[#allocation10 + $0x18] sm:$0xff]  ;;  %v530_v8 = vld [vmem:[#allocation10 + $0x10] sm:$0xff]  ;;  %v529_v9 = vld [vmem:[#allocation10 + $0x8] sm:$0xff] }
  0x52   :  { %706 = vmatprep.subr.mxu0 %v929_v0  ;;  %739 = vmatprep.subr.mxu1 %v929_v0  ;;  %v528_v10 = vld [vmem:[#allocation10] sm:$0xff] }
  0x53   :  { %707 = vmatpush3.msra.mxu0 %v266_v14  ;;  %740 = vmatpush3.msra.mxu1 %v350_v53 }
  0x54   :  { %708 = vmatprep.subr.mxu0 %v929_v0  ;;  %744 = vmatprep.subr.mxu1 %v929_v0 }
  0x55   :  { %709 = vmatpush3.msra.mxu0 %v265_v15 }
  0x56   :  { %710 = vmatprep.subr.mxu0 %v929_v0 }
  0x57   :  { %711 = vmatpush3.msra.mxu0 %v264_v16 }
  0x58   :  { %712 = vmatprep.subr.mxu0 %v929_v0 }
  0x59   :  { %713 = vmatpush3.msra.mxu0 %v263_v17 }
  0x5a   :  { %714 = vmatprep.subr.mxu0 %v929_v0 }
  0x5b   :  { %715 = vmatpush3.msra.mxu0 %v262_v18 }
  0x5c   :  { %716 = vmatprep.subr.mxu0 %v929_v0 }
  0x5d   :  { %717 = vmatpush3.msra.mxu0 %v261_v19 }
  0x5e   :  { %718 = vmatprep.subr.mxu0 %v929_v0 }
  0x5f   :  { %719 = vmatpush3.msra.mxu0 %v260_v20 }
  0x60   :  { %720 = vmatprep.subr.mxu0 %v929_v0 }
  0x61   :  { %721 = vmatpush3.msra.mxu0 %v259_v21 }
  0x62   :  { %722 = vmatprep.subr.mxu0 %v929_v0 }
  0x63   :  { %723 = vmatpush3.msra.mxu0 %v258_v22 }
  0x64   :  { %724 = vmatprep.subr.mxu0 %v929_v0 }
  0x65   :  { %725 = vmatpush3.msra.mxu0 %v257_v23 }
  0x66   :  { %638 = vmatprep.subr.msk.mxu0 %vm98_vm1, %v364_v36 }
 0x105   :  { %v174_v24 = vpop.f32.mrf.mxu0  ;;  %v245_v25 = vpop.f32.mrf.mxu1 }
 0x106   :  { %v249_v26 = vmax.f32 %v174_v24, 0.0  ;;  %v254_v27 = vmax.f32 %v245_v25, 0.0 }
 0x107   :  { %v176_v28 = vpop.f32.mrf.mxu0  ;;  %v693_v29 = vpop.f32.mrf.mxu1 }
 0x108   :  { %v251_v30 = vmax.f32 %v176_v28, 0.0  ;;  %v250_v31 = vmin.f32 %v249_v26, 1.0  ;;  %v255_v33 = vmin.f32 %v254_v27, 1.0 }
 0x10a   :  { %v252_v32 = vmin.f32 %v251_v30, 1.0 }
 0x10c   :  { %v253_v34 = vmul.f32 %v252_v32, %v250_v31 }
 0x10e   :  { %v256_v35 = vmul.f32 %v255_v33, %v253_v34 }
 0x110   :  { %727 = vmatmul.mubr.f32.vlgmr.msra.gmra.mxu0 %v256_v35 }
 0x111   :  { %443 = vmatprep.mubr.f32.mxu0 %v929_v0  ;;  %639 = vmatpush1.msk.msra.mxu0 %vm98_vm1, %v363_v37 }
 0x112   :  { %401 = vmatprep.subr.mxu0 %v361_v39 }
 0x113   :  { %402 = vmatpush1.msra.mxu0 %v360_v40 }
 0x114   :  { %403 = vmatprep.subr.mxu0 %v358_v42 }
 0x115   :  { %404 = vmatpush1.msra.mxu0 %v357_v44 }
 0x116   :  { %405 = vmatprep.subr.mxu0 %v355_v45 }
 0x117   :  { %406 = vmatpush1.msra.mxu0 %v354_v47 }
 0x118   :  { %407 = vmatprep.subr.mxu0 %v352_v48 }
 0x119   :  { %408 = vmatpush1.msra.mxu0 %v351_v50 }
 0x11a   :  { %409 = vmatprep.subr.mxu0 %v349_v51 }
 0x11b   :  { %410 = vmatpush1.msra.mxu0 %v348_v52 }
 0x1d0   :  { %v1023_v54 = vpop.f32.mrf.mxu0 }
 0x1d1   :  { %344 = vrot.lane.b32.xlu0 %v1023_v54, %s931_s2 }
 0x1d2   :  { %v728_v55 = vpop.f32.mrf.mxu0 }
 0x243   :  { %v345_v56 = vpop.permute.xlu0 %344 }
 0x244   :  { %v347_v58 = vsel %vm94_vm2, %v985_v6, %v345_v56  ;;  %v532_v6 = vld [vmem:[#allocation10 + $0x20] sm:$0xff] }
 0x245   :  { %640 = vmatmul.mubr.msk.f32.vlgmr.msra.gmra.mxu0 %vm366_vm3, %v347_v58  ;;  %742 = vmatmul.mubr.msk.f32.vlgmr.msra.gmra.mxu1 %vm366_vm3, %v347_v58 }
 0x246   :  { %745 = vmatpush3.msra.mxu1 %v543_v57  ;;  %776 = vmatprep.mubr.msk.f32.mxu1 %vm930_vm0, %v929_v0 }
 0x247   :  { %746 = vmatprep.subr.mxu1 %v929_v0 }
 0x248   :  { %747 = vmatpush3.msra.mxu1 %v542_v59 }
 0x249   :  { %748 = vmatprep.subr.mxu1 %v929_v0 }
 0x24a   :  { %749 = vmatpush3.msra.mxu1 %v541_v60 }
 0x24b   :  { %750 = vmatprep.subr.mxu1 %v929_v0 }
 0x24c   :  { %751 = vmatpush3.msra.mxu1 %v540_v61 }
 0x24d   :  { %752 = vmatprep.subr.mxu1 %v929_v0 }
 0x24e   :  { %753 = vmatpush3.msra.mxu1 %v539_v62 }
 0x24f   :  { %754 = vmatprep.subr.mxu1 %v929_v0 }
 0x250   :  { %755 = vmatpush3.msra.mxu1 %v538_v63 }
 0x251   :  { %756 = vmatprep.subr.mxu1 %v929_v0 }
 0x252   :  { %757 = vmatpush3.msra.mxu1 %v537_v1 }
 0x253   :  { %758 = vmatprep.subr.mxu1 %v929_v0 }
 0x254   :  { %759 = vmatpush3.msra.mxu1 %v536_v2 }
 0x255   :  { %760 = vmatprep.subr.mxu1 %v929_v0 }
 0x256   :  { %761 = vmatpush3.msra.mxu1 %v535_v3 }
 0x257   :  { %762 = vmatprep.subr.mxu1 %v929_v0 }
 0x258   :  { %763 = vmatpush3.msra.mxu1 %v534_v4 }
 0x259   :  { %764 = vmatprep.subr.mxu1 %v929_v0 }
 0x25a   :  { %765 = vmatpush3.msra.mxu1 %v533_v5 }
 0x25b   :  { %766 = vmatprep.subr.mxu1 %v929_v0 }
 0x25c   :  { %767 = vmatpush3.msra.mxu1 %v532_v6 }
 0x25d   :  { %768 = vmatprep.subr.mxu1 %v929_v0 }
 0x25e   :  { %769 = vmatpush3.msra.mxu1 %v531_v7 }
 0x25f   :  { %770 = vmatprep.subr.mxu1 %v929_v0 }
 0x260   :  { %771 = vmatpush3.msra.mxu1 %v530_v8 }
 0x261   :  { %772 = vmatprep.subr.mxu1 %v929_v0 }
 0x262   :  { %773 = vmatpush3.msra.mxu1 %v529_v9 }
 0x263   :  { %774 = vmatprep.subr.mxu1 %v929_v0 }
 0x264   :  { %775 = vmatpush3.msra.mxu1 %v528_v10 }
 0x305   :  { %v445_v11 = vpop.f32.mrf.mxu0  ;;  %v516_v12 = vpop.f32.mrf.mxu1 }
 0x306   :  { %v520_v13 = vmax.f32 %v445_v11, 0.0  ;;  %v525_v16 = vmax.f32 %v516_v12, 0.0 }
 0x307   :  { %v447_v14 = vpop.f32.mrf.mxu0  ;;  %v743_v15 = vpop.f32.mrf.mxu1 }
 0x308   :  { %v522_v17 = vmax.f32 %v447_v14, 0.0  ;;  %v521_v18 = vmin.f32 %v520_v13, 1.0  ;;  %v526_v20 = vmin.f32 %v525_v16, 1.0 }
 0x30a   :  { %v523_v19 = vmin.f32 %v522_v17, 1.0 }
 0x30c   :  { %v524_v21 = vmul.f32 %v523_v19, %v521_v18 }
 0x30e   :  { %v527_v22 = vmul.f32 %v526_v20, %v524_v21 }
 0x310   :  { %777 = vmatmul.mubr.f32.vlgmr.msra.gmra.mxu1 %v527_v22 }
 0x3d0   :  { %v610_v23 = vpop.f32.mrf.mxu1 }
 0x3d1   :  { %v614_v0 = vadd.f32 %v610_v23, %v1023_v54 }
 0x3d2   :  { %v778_v24 = vpop.f32.mrf.mxu1 }
 0x3d3   :  { %615 = vst [vmem:[#allocation11] sm:$0xff] %v614_v0 }
 0x3d4   :  { %903 = shalt.err (!%p900_p1)
}
 0x3d5   :  { %625 = dma.vmem_to_hbm [thread:$0]  %s623_s19, 128, %s1054_s5, [#allocation4]  }
 0x3d6   :  { %918 = dma.done.wait [#allocation4], 128  }
 0x3d7   :  { %919 = vsyncadd [#allocation4], 4294967168 }
 0x3d8   :  { %629 = vsyncpa [#allocation3], 1 }
 0x3d9   :  { %630 = vsyncpa [#allocation6], 1 }
 0x3da   :  { %631 = vsyncpa [#allocation9], 1 }
 0x3db   :  { %632 = vsyncpa [#allocation4], 1 }

</bundles_post_ra>
